<compile_context>
chip_gen: v7x
topology: tpu7x:2x2x1
jax: 0.10.0
libtpu: 0.0.40
codegen_flags: <defaults>
</compile_context>

<pallas_src>
import functools

import numpy as np
import jax
import jax.numpy as jnp
from jax.experimental import pallas as pl
from jax.experimental.pallas import tpu as pltpu

LANE_CHUNK = 128          # lanes processed per inner-chunk iteration (one vreg width)
MAX_CHUNKS_PER_BLOCK = 4  # -> up to 512-lane blocks per grid step


def _signature_channels(d: int, depth: int) -> int:
    # same as signatory.signature_channels(d, depth)
    return sum(d ** i for i in range(1, depth + 1))


def _make_segment_signature_kernel(depth: int):
    """Kernel: truncated signature (levels 1..depth) of every path in the block.

    x_ref    : (seg_len, d, block_n)   path points, paths on lanes
    out_refs : depth refs, out_refs[r] has shape (d**(r+1), block_n)
    """

    def kernel(x_ref, *out_refs):
        seg_len, d, block_n = x_ref.shape
        num_chunks = block_n // LANE_CHUNK

        if seg_len < 2:
            # A single point has zero signature increments.  (signatory would
            # reject a 1-point path; we return zeros instead.)
            for o in out_refs:
                o[...] = jnp.zeros_like(o)
            return

        def outer(a, b):
            # Flattened tensor product: row (i * rb + j) = a[i] * b[j].
            # Single fused broadcast-multiply + one packing reshape (no per-row
            # sublane slice / concatenate).
            ra, n = a.shape
            rb = b.shape[0]
            return (a[:, None, :] * b[None, :, :]).reshape(ra * rb, n)

        def exp_levels(delta):
            # exp(delta) truncated: level r = delta^{(x) r} / r!
            levels = [delta]
            for n in range(2, depth + 1):
                levels.append(outer(levels[-1], delta) * (1.0 / n))
            return levels

        # Iterate 128-lane sub-chunks of the (possibly 512-wide) lane block so
        # the live vreg set per Chen recursion stays ~128 lanes wide.
        for c in range(num_chunks):
            lanes = pl.ds(c * LANE_CHUNK, LANE_CHUNK)

            # All increments of this chunk in one vectorized subtract.
            dx = (x_ref[pl.ds(1, seg_len - 1), :, lanes]
                  - x_ref[pl.ds(0, seg_len - 1), :, lanes])   # (seg_len-1, d, 128)

            # Signature of the first linear piece.
            sig = exp_levels(dx[0])

            # Chen's identity: S <- S (x) exp(delta_t) for each further increment.
            # TODO(synk): for seg_len >> 16 switch this static unroll to a
            # lax.fori_loop carrying the level tensors to bound code size.
            for t in range(1, seg_len - 1):
                exps = exp_levels(dx[t])
                new_sig = []
                for n in range(1, depth + 1):
                    acc = sig[n - 1] + exps[n - 1]
                    for j in range(1, n):
                        acc = acc + outer(sig[j - 1], exps[n - 1 - j])
                    new_sig.append(acc)
                sig = new_sig

            for r in range(depth):
                out_refs[r][:, lanes] = sig[r]

    return kernel


def segment_signatures(x, signature_lvl: int, num_segments: int):
    """x: (batch, in_channels, frames, nodes)
       -> (batch, out_channels, num_segments, nodes), out_channels = sum d^i."""
    batch, d, frames, nodes = x.shape
    assert frames % num_segments == 0, "frames must be divisible by num_segments"
    seg_len = frames // num_segments
    S = num_segments
    n_paths = batch * S * nodes
    out_ch = _signature_channels(d, signature_lvl)

    # --- single input relayout: (B, C, T, V) -> (seg_len, C, B*S*V) ---
    # path index n = (b*S + s)*V + v, so the output only needs a leading-axes swap.
    xk = jnp.transpose(
        x.reshape(batch, d, S, seg_len, nodes), (3, 1, 0, 2, 4)
    ).reshape(seg_len, d, n_paths).astype(jnp.float32)

    # --- lane block choice: target ~512 lanes/step, keep grid >= 2 when possible
    # (v7x megacore sharding of the "parallel" axis). ---
    n128 = pl.cdiv(n_paths, LANE_CHUNK)
    chunks = max(1, min(MAX_CHUNKS_PER_BLOCK, n128 // 2))
    block_n = chunks * LANE_CHUNK
    n_blocks = pl.cdiv(n_paths, block_n)
    n_pad = n_blocks * block_n
    if n_pad != n_paths:
        xk = jnp.pad(xk, ((0, 0), (0, 0), (0, n_pad - n_paths)))

    out_shapes = tuple(jax.ShapeDtypeStruct((d ** r, n_pad), jnp.float32)
                       for r in range(1, signature_lvl + 1))
    out_specs = tuple(pl.BlockSpec((d ** r, block_n), lambda i: (0, i))
                      for r in range(1, signature_lvl + 1))

    # Advisory cost estimate (VPU-bound elementwise kernel; MXU unused).
    flops_per_path_step = (
        sum(2 * d ** r for r in range(2, signature_lvl + 1))
        + sum((2 * n - 1) * d ** n for n in range(1, signature_lvl + 1)))
    cost = pl.CostEstimate(
        flops=int(n_pad * max(seg_len - 1, 1) * flops_per_path_step),
        transcendentals=0,
        bytes_accessed=int(4 * n_pad * (seg_len * d + out_ch)),
    )

    levels = pl.pallas_call(
        _make_segment_signature_kernel(signature_lvl),
        out_shape=out_shapes,
        grid=(n_blocks,),
        in_specs=[pl.BlockSpec((seg_len, d, block_n), lambda i: (0, 0, i))],
        out_specs=out_specs,
        compiler_params=pltpu.CompilerParams(dimension_semantics=("parallel",)),
        cost_estimate=cost,
    )(xk)

    # --- glue back: concat levels, drop lane padding, swap leading axes ---
    sig = jnp.concatenate(levels, axis=0)[:, :n_paths]   # (C_out, B*S*V)
    sig = sig.reshape(out_ch, batch, S, nodes)            # (C_out, B, S, V)
    return jnp.transpose(sig, (1, 0, 2, 3))               # (B, C_out, S, V)


# ----------------------- numpy reference (for checking) -----------------------
def _np_signature(path, depth):
    incs = np.diff(path, axis=0)

    def exp_inc(dx):
        levels = [dx]
        for n in range(2, depth + 1):
            levels.append(np.multiply.outer(levels[-1], dx) / n)
        return levels

    sig = exp_inc(incs[0])
    for dx in incs[1:]:
        exps = exp_inc(dx)
        new_sig = []
        for n in range(1, depth + 1):
            acc = sig[n - 1] + exps[n - 1]
            for j in range(1, n):
                acc = acc + np.multiply.outer(sig[j - 1], exps[n - 1 - j])
            new_sig.append(acc)
        sig = new_sig
    return np.concatenate([lvl.reshape(-1) for lvl in sig])


def _reference(x, depth, num_segments):
    batch, d, frames, nodes = x.shape
    seg_len = frames // num_segments
    out_ch = _signature_channels(d, depth)
    out = np.zeros((batch, out_ch, num_segments, nodes), np.float32)
    for b in range(batch):
        for v in range(nodes):
            path = x[b, :, :, v].T  # (frames, d)
            for s in range(num_segments):
                seg = path[s * seg_len:(s + 1) * seg_len]
                out[b, :, s, v] = _np_signature(seg, depth)
    return out


def _check(batch, in_channels, frames, nodes, signature_lvl, num_segments, seed):
    key = jax.random.PRNGKey(seed)
    x = jax.random.normal(key, (batch, in_channels, frames, nodes), dtype=jnp.float32)
    fn = jax.jit(functools.partial(
        segment_signatures, signature_lvl=signature_lvl, num_segments=num_segments))
    out = jax.block_until_ready(fn(x))
    assert out.shape == (batch, _signature_channels(in_channels, signature_lvl),
                         num_segments, nodes)
    ref = _reference(np.asarray(x), signature_lvl, num_segments)
    np.testing.assert_allclose(np.asarray(out), ref, rtol=1e-4, atol=1e-4)


if __name__ == "__main__":
    # Small canonical shape (single 128-lane block).
    _check(batch=2, in_channels=4, frames=16, nodes=16,
           signature_lvl=3, num_segments=4, seed=0)
    # Larger shape exercising multi-chunk blocks, multiple grid steps and lane padding.
    _check(batch=2, in_channels=4, frames=16, nodes=60,
           signature_lvl=3, num_segments=4, seed=0)
    print("KERNEL_OK")
</pallas_src>

<mosaic_0001>
module attributes {stable_mosaic.version = 11 : i64} {
  func.func @kernel(%arg0: i32, %arg1: memref<4x4x128xf32, #tpu.memory_space<vmem>>, %arg2: memref<4x128xf32, #tpu.memory_space<vmem>>, %arg3: memref<16x128xf32, #tpu.memory_space<vmem>>, %arg4: memref<64x128xf32, #tpu.memory_space<vmem>>) attributes {dimension_semantics = [#tpu.dimension_semantics<parallel>], iteration_bounds = array<i64: 1>, scalar_prefetch = 0 : i64, scratch_operands = 0 : i64, tpu.core_type = #tpu.core_type<tc>, window_params = [{transform_indices = @transform_0, window_bounds = array<i64: 4, 4, 128>}, {transform_indices = @transform_1, window_bounds = array<i64: 4, 128>}, {transform_indices = @transform_2, window_bounds = array<i64: 16, 128>}, {transform_indices = @transform_3, window_bounds = array<i64: 64, 128>}]} {
    %c1 = arith.constant 1 : index
    %c0 = arith.constant 0 : index
    %c0_0 = arith.constant 0 : index
    %0 = vector.load %arg1[%c1, %c0, %c0_0] : memref<4x4x128xf32, #tpu.memory_space<vmem>>, vector<3x4x128xf32>
    %c0_1 = arith.constant 0 : index
    %c0_2 = arith.constant 0 : index
    %c0_3 = arith.constant 0 : index
    %1 = vector.load %arg1[%c0_1, %c0_2, %c0_3] : memref<4x4x128xf32, #tpu.memory_space<vmem>>, vector<3x4x128xf32>
    %2 = arith.subf %0, %1 : vector<3x4x128xf32>
    %3 = vector.extract_strided_slice %2 {offsets = [0, 0, 0], sizes = [1, 4, 128], strides = [1, 1, 1]} : vector<3x4x128xf32> to vector<1x4x128xf32>
    %4 = vector.shape_cast %3 : vector<1x4x128xf32> to vector<4x128xf32>
    %5 = vector.shape_cast %4 : vector<4x128xf32> to vector<4x1x128xf32>
    %6 = vector.shape_cast %4 : vector<4x128xf32> to vector<1x4x128xf32>
    %7 = vector.broadcast %5 : vector<4x1x128xf32> to vector<4x4x128xf32>
    %8 = vector.broadcast %6 : vector<1x4x128xf32> to vector<4x4x128xf32>
    %9 = arith.mulf %7, %8 : vector<4x4x128xf32>
    %10 = vector.shape_cast %9 : vector<4x4x128xf32> to vector<16x128xf32>
    %cst = arith.constant 5.000000e-01 : f32
    %11 = vector.broadcast %cst : f32 to vector<16x128xf32>
    %12 = arith.mulf %10, %11 : vector<16x128xf32>
    %13 = vector.shape_cast %12 : vector<16x128xf32> to vector<16x1x128xf32>
    %14 = vector.shape_cast %4 : vector<4x128xf32> to vector<1x4x128xf32>
    %15 = vector.broadcast %13 : vector<16x1x128xf32> to vector<16x4x128xf32>
    %16 = vector.broadcast %14 : vector<1x4x128xf32> to vector<16x4x128xf32>
    %17 = arith.mulf %15, %16 : vector<16x4x128xf32>
    %18 = vector.shape_cast %17 : vector<16x4x128xf32> to vector<64x128xf32>
    %cst_4 = arith.constant 0.333333343 : f32
    %19 = vector.broadcast %cst_4 : f32 to vector<64x128xf32>
    %20 = arith.mulf %18, %19 : vector<64x128xf32>
    %21 = vector.extract_strided_slice %2 {offsets = [1, 0, 0], sizes = [1, 4, 128], strides = [1, 1, 1]} : vector<3x4x128xf32> to vector<1x4x128xf32>
    %22 = vector.shape_cast %21 : vector<1x4x128xf32> to vector<4x128xf32>
    %23 = vector.shape_cast %22 : vector<4x128xf32> to vector<4x1x128xf32>
    %24 = vector.shape_cast %22 : vector<4x128xf32> to vector<1x4x128xf32>
    %25 = vector.broadcast %23 : vector<4x1x128xf32> to vector<4x4x128xf32>
    %26 = vector.broadcast %24 : vector<1x4x128xf32> to vector<4x4x128xf32>
    %27 = arith.mulf %25, %26 : vector<4x4x128xf32>
    %28 = vector.shape_cast %27 : vector<4x4x128xf32> to vector<16x128xf32>
    %cst_5 = arith.constant 5.000000e-01 : f32
    %29 = vector.broadcast %cst_5 : f32 to vector<16x128xf32>
    %30 = arith.mulf %28, %29 : vector<16x128xf32>
    %31 = vector.shape_cast %30 : vector<16x128xf32> to vector<16x1x128xf32>
    %32 = vector.shape_cast %22 : vector<4x128xf32> to vector<1x4x128xf32>
    %33 = vector.broadcast %31 : vector<16x1x128xf32> to vector<16x4x128xf32>
    %34 = vector.broadcast %32 : vector<1x4x128xf32> to vector<16x4x128xf32>
    %35 = arith.mulf %33, %34 : vector<16x4x128xf32>
    %36 = vector.shape_cast %35 : vector<16x4x128xf32> to vector<64x128xf32>
    %cst_6 = arith.constant 0.333333343 : f32
    %37 = vector.broadcast %cst_6 : f32 to vector<64x128xf32>
    %38 = arith.mulf %36, %37 : vector<64x128xf32>
    %39 = arith.addf %4, %22 : vector<4x128xf32>
    %40 = arith.addf %12, %30 : vector<16x128xf32>
    %41 = vector.shape_cast %4 : vector<4x128xf32> to vector<4x1x128xf32>
    %42 = vector.shape_cast %22 : vector<4x128xf32> to vector<1x4x128xf32>
    %43 = vector.broadcast %41 : vector<4x1x128xf32> to vector<4x4x128xf32>
    %44 = vector.broadcast %42 : vector<1x4x128xf32> to vector<4x4x128xf32>
    %45 = arith.mulf %43, %44 : vector<4x4x128xf32>
    %46 = vector.shape_cast %45 : vector<4x4x128xf32> to vector<16x128xf32>
    %47 = arith.addf %40, %46 : vector<16x128xf32>
    %48 = arith.addf %20, %38 : vector<64x128xf32>
    %49 = vector.shape_cast %4 : vector<4x128xf32> to vector<4x1x128xf32>
    %50 = vector.shape_cast %30 : vector<16x128xf32> to vector<1x16x128xf32>
    %51 = vector.broadcast %49 : vector<4x1x128xf32> to vector<4x16x128xf32>
    %52 = vector.broadcast %50 : vector<1x16x128xf32> to vector<4x16x128xf32>
    %53 = arith.mulf %51, %52 : vector<4x16x128xf32>
    %54 = vector.shape_cast %53 : vector<4x16x128xf32> to vector<64x128xf32>
    %55 = arith.addf %48, %54 : vector<64x128xf32>
    %56 = vector.shape_cast %12 : vector<16x128xf32> to vector<16x1x128xf32>
    %57 = vector.shape_cast %22 : vector<4x128xf32> to vector<1x4x128xf32>
    %58 = vector.broadcast %56 : vector<16x1x128xf32> to vector<16x4x128xf32>
    %59 = vector.broadcast %57 : vector<1x4x128xf32> to vector<16x4x128xf32>
    %60 = arith.mulf %58, %59 : vector<16x4x128xf32>
    %61 = vector.shape_cast %60 : vector<16x4x128xf32> to vector<64x128xf32>
    %62 = arith.addf %55, %61 : vector<64x128xf32>
    %63 = vector.extract_strided_slice %2 {offsets = [2, 0, 0], sizes = [1, 4, 128], strides = [1, 1, 1]} : vector<3x4x128xf32> to vector<1x4x128xf32>
    %64 = vector.shape_cast %63 : vector<1x4x128xf32> to vector<4x128xf32>
    %65 = vector.shape_cast %64 : vector<4x128xf32> to vector<4x1x128xf32>
    %66 = vector.shape_cast %64 : vector<4x128xf32> to vector<1x4x128xf32>
    %67 = vector.broadcast %65 : vector<4x1x128xf32> to vector<4x4x128xf32>
    %68 = vector.broadcast %66 : vector<1x4x128xf32> to vector<4x4x128xf32>
    %69 = arith.mulf %67, %68 : vector<4x4x128xf32>
    %70 = vector.shape_cast %69 : vector<4x4x128xf32> to vector<16x128xf32>
    %cst_7 = arith.constant 5.000000e-01 : f32
    %71 = vector.broadcast %cst_7 : f32 to vector<16x128xf32>
    %72 = arith.mulf %70, %71 : vector<16x128xf32>
    %73 = vector.shape_cast %72 : vector<16x128xf32> to vector<16x1x128xf32>
    %74 = vector.shape_cast %64 : vector<4x128xf32> to vector<1x4x128xf32>
    %75 = vector.broadcast %73 : vector<16x1x128xf32> to vector<16x4x128xf32>
    %76 = vector.broadcast %74 : vector<1x4x128xf32> to vector<16x4x128xf32>
    %77 = arith.mulf %75, %76 : vector<16x4x128xf32>
    %78 = vector.shape_cast %77 : vector<16x4x128xf32> to vector<64x128xf32>
    %cst_8 = arith.constant 0.333333343 : f32
    %79 = vector.broadcast %cst_8 : f32 to vector<64x128xf32>
    %80 = arith.mulf %78, %79 : vector<64x128xf32>
    %81 = arith.addf %39, %64 : vector<4x128xf32>
    %82 = arith.addf %47, %72 : vector<16x128xf32>
    %83 = vector.shape_cast %39 : vector<4x128xf32> to vector<4x1x128xf32>
    %84 = vector.shape_cast %64 : vector<4x128xf32> to vector<1x4x128xf32>
    %85 = vector.broadcast %83 : vector<4x1x128xf32> to vector<4x4x128xf32>
    %86 = vector.broadcast %84 : vector<1x4x128xf32> to vector<4x4x128xf32>
    %87 = arith.mulf %85, %86 : vector<4x4x128xf32>
    %88 = vector.shape_cast %87 : vector<4x4x128xf32> to vector<16x128xf32>
    %89 = arith.addf %82, %88 : vector<16x128xf32>
    %90 = arith.addf %62, %80 : vector<64x128xf32>
    %91 = vector.shape_cast %39 : vector<4x128xf32> to vector<4x1x128xf32>
    %92 = vector.shape_cast %72 : vector<16x128xf32> to vector<1x16x128xf32>
    %93 = vector.broadcast %91 : vector<4x1x128xf32> to vector<4x16x128xf32>
    %94 = vector.broadcast %92 : vector<1x16x128xf32> to vector<4x16x128xf32>
    %95 = arith.mulf %93, %94 : vector<4x16x128xf32>
    %96 = vector.shape_cast %95 : vector<4x16x128xf32> to vector<64x128xf32>
    %97 = arith.addf %90, %96 : vector<64x128xf32>
    %98 = vector.shape_cast %47 : vector<16x128xf32> to vector<16x1x128xf32>
    %99 = vector.shape_cast %64 : vector<4x128xf32> to vector<1x4x128xf32>
    %100 = vector.broadcast %98 : vector<16x1x128xf32> to vector<16x4x128xf32>
    %101 = vector.broadcast %99 : vector<1x4x128xf32> to vector<16x4x128xf32>
    %102 = arith.mulf %100, %101 : vector<16x4x128xf32>
    %103 = vector.shape_cast %102 : vector<16x4x128xf32> to vector<64x128xf32>
    %104 = arith.addf %97, %103 : vector<64x128xf32>
    %c0_9 = arith.constant 0 : index
    %c0_10 = arith.constant 0 : index
    %105 = vector.load %arg2[%c0_9, %c0_10] : memref<4x128xf32, #tpu.memory_space<vmem>>, vector<4x128xf32>
    tpu.vector_store %arg2[%c0_9, %c0_10], %81 {strides = array<i32>} : memref<4x128xf32, #tpu.memory_space<vmem>>, vector<4x128xf32>,
    %c0_11 = arith.constant 0 : index
    %c0_12 = arith.constant 0 : index
    %106 = vector.load %arg3[%c0_11, %c0_12] : memref<16x128xf32, #tpu.memory_space<vmem>>, vector<16x128xf32>
    tpu.vector_store %arg3[%c0_11, %c0_12], %89 {strides = array<i32>} : memref<16x128xf32, #tpu.memory_space<vmem>>, vector<16x128xf32>,
    %c0_13 = arith.constant 0 : index
    %c0_14 = arith.constant 0 : index
    %107 = vector.load %arg4[%c0_13, %c0_14] : memref<64x128xf32, #tpu.memory_space<vmem>>, vector<64x128xf32>
    tpu.vector_store %arg4[%c0_13, %c0_14], %104 {strides = array<i32>} : memref<64x128xf32, #tpu.memory_space<vmem>>, vector<64x128xf32>,
    return
  }
  func.func @transform_0(%arg0: i32) -> (i32, i32, i32) {
    %c0_i32 = arith.constant 0 : i32
    %c0_i32_0 = arith.constant 0 : i32
    %c0_i32_1 = arith.constant 0 : i32
    return %c0_i32, %c0_i32_0, %arg0 : i32, i32, i32
  }
  func.func @transform_1(%arg0: i32) -> (i32, i32) {
    %c0_i32 = arith.constant 0 : i32
    %c0_i32_0 = arith.constant 0 : i32
    return %c0_i32, %arg0 : i32, i32
  }
  func.func @transform_2(%arg0: i32) -> (i32, i32) {
    %c0_i32 = arith.constant 0 : i32
    %c0_i32_0 = arith.constant 0 : i32
    return %c0_i32, %arg0 : i32, i32
  }
  func.func @transform_3(%arg0: i32) -> (i32, i32) {
    %c0_i32 = arith.constant 0 : i32
    %c0_i32_0 = arith.constant 0 : i32
    return %c0_i32, %arg0 : i32, i32
  }
}

</mosaic_0001>

<bundles_post_ra>
// kernel: segment_signatures.1
= control target key start
LH: loop header
LB: loop body
LE: loop exit
PB: predicated region body
PF: predicated region fallthrough
CT: control target
= control target key end

     0   :  { %v25_v0 = vlaneseq  ;;  %v1334_v4 = vmov 1966171168   ;;  %s1875_s0 = inlined_call_operand.vmem [shape: f32[4,4,128], index: 0, kind: input, shape index: {}]   ;;  %s1876_s1 = inlined_call_operand.vmem [shape: f32[4,128], index: 1, kind: output, shape index: {0}]   ;;  %s1877_s2 = inlined_call_operand.vmem [shape: f32[16,128], index: 2, kind: output, shape index: {1}]   ;;  %s1878_s3 = inlined_call_operand.vmem [shape: f32[64,128], index: 3, kind: output, shape index: {2}]  }
   0x1   :  { %v1330_v1 = vld [vmem:[%s1875_s0 + $0x4] sm:$0xf]  ;;  %v1331_v2 = vld [vmem:[%s1875_s0 + $0x8] sm:$0xf]  ;;  %v1332_v3 = vld [vmem:[%s1875_s0 + $0xc] sm:$0xf]  ;;  %v23_v5 = vunpack.c.l.s4 %v1334_v4 }
   0x2   :  { %v15_v6 = vld [vmem:[%s1875_s0] sm:$0xf]  ;;  %v16_v7 = vld [vmem:[%s1875_s0 + $0x4] sm:$0xf]  ;;  %v17_v8 = vld [vmem:[%s1875_s0 + $0x8] sm:$0xf] }
   0x3   :  { %v1373_v9 = vsub.f32 %v1330_v1, %v15_v6  ;;  %v1375_v10 = vsub.f32 %v1331_v2, %v16_v7  ;;  %v24_v11 = vunpack.c.0.s8 %v23_v5  ;;  %v1377_v12 = vsub.f32 %v1332_v3, %v17_v8 }
   0x4   :  { %v26_v13 = vshrl.u32 %v25_v0, 7 }
   0x5   :  { %v551_v14 = vadd.f32 %v1375_v10, %v1373_v9 }
   0x6   :  { %v1381_v15 = vsub.s32 %v24_v11, %v26_v13  ;;  %v1391_v21 = vsub.s32 0, %v26_v13 }
   0x7   :  { %v929_v16 = vadd.f32 %v551_v14, %v1377_v12 }
   0x8   :  { %v941_v17 = vrot.slane %v551_v14, %v1381_v15  ;;  %v28_v18 = vrot.slane %v1373_v9, %v1381_v15  ;;  %v293_v19 = vrot.slane %v1375_v10, %v1381_v15  ;;  %v671_v20 = vrot.slane %v1377_v12, %v1381_v15 }
   0x9   :  { %1267 = vst [vmem:[%s1876_s1] sm:$0xf] %v929_v16 }
   0xa   :  { %v942_v22 = vcombine.high %v941_v17, %v941_v17  ;;  %v1397_v23 = vrot.slane %v941_v17, %v1381_v15  ;;  %v29_v24 = vcombine.high %v28_v18, %v28_v18  ;;  %v36_v25 = vrot.slane %v28_v18, %v1381_v15 }
   0xb   :  { %v294_v26 = vcombine.high %v293_v19, %v293_v19  ;;  %v301_v27 = vrot.slane %v293_v19, %v1381_v15  ;;  %v672_v28 = vcombine.high %v671_v20, %v671_v20  ;;  %v1408_v32 = vrot.slane %v671_v20, %v1381_v15 }
   0xc   :  { %v1402_v29 = vrot.slane %v942_v22, %v1381_v15  ;;  %v957_v30 = vcombine.high %v1397_v23, %v1397_v23  ;;  %v43_v31 = vrot.slane %v29_v24, %v1381_v15  ;;  %v1412_v33 = vrot.slane %v1397_v23, %v1391_v21 }
   0xd   :  { %v1415_v34 = vrot.slane %v36_v25, %v1391_v21  ;;  %v308_v35 = vrot.slane %v294_v26, %v1381_v15  ;;  %v314_v36 = vrot.slane %v301_v27, %v1391_v21  ;;  %v1425_v39 = vrot.slane %v672_v28, %v1381_v15 }
   0xe   :  { %v958_v37 = vcombine.high %v1402_v29, %v1402_v29  ;;  %v1422_v38 = vrot.slane %v43_v31, %v1391_v21  ;;  %v692_v40 = vrot.slane %v1408_v32, %v1391_v21  ;;  %v1435_v44 = vrot.slane %v1402_v29, %v1391_v21 }
   0xf   :  { %v66_v41 = vmul.f32 %v1415_v34, %v1373_v9  ;;  %v318_v42 = vrot.slane %v308_v35, %v1391_v21  ;;  %v331_v43 = vmul.f32 %v314_v36, %v1375_v10  ;;  %v556_v46 = vmul.f32 %v1415_v34, %v1375_v10 }
  0x10   :  { %v67_v45 = vmul.f32 %v1422_v38, %v1373_v9  ;;  %v696_v47 = vrot.slane %v1425_v39, %v1391_v21  ;;  %v709_v48 = vmul.f32 %v692_v40, %v1377_v12  ;;  %v557_v52 = vmul.f32 %v1422_v38, %v1375_v10 }
  0x11   :  { %v70_v49 = vmul.f32 0.5, %v66_v41  ;;  %v332_v50 = vmul.f32 %v318_v42, %v1375_v10  ;;  %v335_v51 = vmul.f32 0.5, %v331_v43  ;;  %v979_v56 = vmul.f32 %v1412_v33, %v1377_v12 }
  0x12   :  { %v71_v53 = vmul.f32 0.5, %v67_v45  ;;  %v710_v54 = vmul.f32 %v696_v47, %v1377_v12  ;;  %v713_v55 = vmul.f32 0.5, %v709_v48  ;;  %v980_v63 = vmul.f32 %v1435_v44, %v1377_v12 }
  0x13   :  { %v1451_v57 = vrot.slane %v70_v49, %v1381_v15  ;;  %v336_v58 = vmul.f32 0.5, %v332_v50  ;;  %v1454_v59 = vrot.slane %v335_v51, %v1381_v15  ;;  %v552_v60 = vadd.f32 %v335_v51, %v70_v49 }
  0x14   :  { %v1457_v61 = vrot.slane %v71_v53, %v1381_v15  ;;  %v714_v62 = vmul.f32 0.5, %v710_v54  ;;  %v44_v0 = vcombine.high %v36_v25, %v36_v25  ;;  %v1467_v4 = vrot.slane %v713_v55, %v1381_v15 }
  0x15   :  { %v85_v1 = vcombine.high %v1451_v57, %v1451_v57  ;;  %v1464_v2 = vrot.slane %v336_v58, %v1381_v15  ;;  %v553_v3 = vadd.f32 %v336_v58, %v71_v53  ;;  %v350_v6 = vcombine.high %v1454_v59, %v1454_v59 }
  0x16   :  { %v109_v5 = vcombine.high %v1457_v61, %v1457_v61  ;;  %v560_v7 = vadd.f32 %v556_v46, %v552_v60  ;;  %v1473_v8 = vcombine.low %v335_v51, %v336_v58  ;;  %v1478_v14 = vrot.slane %v714_v62, %v1381_v15 }
  0x17   :  { %v374_v11 = vcombine.high %v1464_v2, %v1464_v2  ;;  %v561_v13 = vadd.f32 %v557_v52, %v553_v3  ;;  %v45_v16 = vcombine.high %v43_v31, %v43_v31  ;;  %v1480_v18 = vcombine.low %v713_v55, %v714_v62 }
  0x18   :  { %v930_v17 = vadd.f32 %v713_v55, %v560_v7  ;;  %v1483_v19 = vrot.slane %v44_v0, %v1391_v21  ;;  %v309_v20 = vcombine.high %v301_v27, %v301_v27  ;;  %v1486_v24 = vrot.slane %v560_v7, %v1381_v15 }
  0x19   :  { %v931_v22 = vadd.f32 %v714_v62, %v561_v13  ;;  %v1489_v25 = vrot.slane %v45_v16, %v1391_v21  ;;  %v310_v26 = vcombine.high %v308_v35, %v308_v35  ;;  %v1492_v36 = vrot.slane %v561_v13, %v1381_v15 }
  0x1a   :  { %v983_v28 = vadd.f32 %v979_v56, %v930_v17  ;;  %v68_v31 = vmul.f32 %v1483_v19, %v1373_v9  ;;  %v322_v40 = vrot.slane %v309_v20, %v1391_v21  ;;  %v558_v43 = vmul.f32 %v1483_v19, %v1375_v10 }
  0x1b   :  { %v984_v41 = vadd.f32 %v980_v63, %v931_v22  ;;  %v69_v27 = vmul.f32 %v1489_v25, %v1373_v9  ;;  %v326_v42 = vrot.slane %v310_v26, %v1391_v21  ;;  %v687_v46 = vcombine.high %v1408_v32, %v1408_v32 }
  0x1c   :  { %v72_v45 = vmul.f32 0.5, %v68_v31  ;;  %v333_v35 = vmul.f32 %v322_v40, %v1375_v10  ;;  %v688_v47 = vcombine.high %v1425_v39, %v1425_v39  ;;  %v1512_v51 = vrot.slane %v957_v30, %v1391_v21 }
  0x1d   :  { %v1272_v48 = vcombine.low %v983_v28, %v984_v41  ;;  %v73_v49 = vmul.f32 0.5, %v69_v27  ;;  %v334_v50 = vmul.f32 %v326_v42, %v1375_v10  ;;  %v700_v54 = vrot.slane %v687_v46, %v1391_v21 }
  0x1e   :  { %v1515_v52 = vrot.slane %v72_v45, %v1381_v15  ;;  %v337_v53 = vmul.f32 0.5, %v333_v35  ;;  %v704_v32 = vrot.slane %v688_v47, %v1391_v21  ;;  %v559_v23 = vmul.f32 %v1489_v25, %v1375_v10 }
  0x1f   :  { %1276 = vst [vmem:[%s1877_s2] sm:$0xff] %v1272_v48  ;;  %v1523_v39 = vrot.slane %v73_v49, %v1381_v15  ;;  %v338_v55 = vmul.f32 0.5, %v334_v50  ;;  %v1531_v30 = vrot.slane %v958_v37, %v1391_v21  ;;  %v711_v60 = vmul.f32 %v700_v54, %v1377_v12 }
  0x20   :  { %v1534_v56 = vrot.slane %v337_v53, %v1381_v15  ;;  %v554_v58 = vadd.f32 %v337_v53, %v72_v45  ;;  %v981_v62 = vmul.f32 %v1512_v51, %v1377_v12  ;;  %v712_v13 = vmul.f32 %v704_v32, %v1377_v12 }
  0x21   :  { %v1544_v3 = vrot.slane %v338_v55, %v1381_v15  ;;  %v555_v29 = vadd.f32 %v338_v55, %v73_v49  ;;  %v1546_v7 = vcombine.low %v337_v53, %v338_v55  ;;  %v715_v16 = vmul.f32 0.5, %v711_v60 }
  0x22   :  { %v562_v37 = vadd.f32 %v558_v43, %v554_v58  ;;  %v92_v26 = vrot.slane %v1451_v57, %v1381_v15  ;;  %v716_v28 = vmul.f32 0.5, %v712_v13  ;;  %v982_v41 = vmul.f32 %v1531_v30, %v1377_v12 }
  0x23   :  { %v563_v22 = vadd.f32 %v559_v23, %v555_v29  ;;  %v1556_v31 = vrot.slane %v715_v16, %v1381_v15  ;;  %v99_v42 = vrot.slane %v85_v1, %v1381_v15  ;;  %v357_v45 = vrot.slane %v1454_v59, %v1381_v15 }
  0x24   :  { %v932_v40 = vadd.f32 %v715_v16, %v562_v37  ;;  %v1561_v27 = vrot.slane %v562_v37, %v1381_v15  ;;  %v177_v43 = vrot.slane %v92_v26, %v1391_v21  ;;  %v1571_v35 = vrot.slane %v716_v28, %v1381_v15 }
  0x25   :  { %v933_v46 = vadd.f32 %v716_v28, %v563_v22  ;;  %v1574_v48 = vrot.slane %v563_v22, %v1381_v15  ;;  %v181_v49 = vrot.slane %v99_v42, %v1391_v21  ;;  %v364_v57 = vrot.slane %v350_v6, %v1381_v15 }
  0x26   :  { %v985_v47 = vadd.f32 %v981_v62, %v932_v40  ;;  %v254_v50 = vmul.f32 %v177_v43, %v1373_v9  ;;  %v442_v1 = vrot.slane %v357_v45, %v1391_v21  ;;  %v1583_v54 = vcombine.low %v715_v16, %v716_v28 }
  0x27   :  { %v986_v53 = vadd.f32 %v982_v41, %v933_v46  ;;  %v584_v32 = vmul.f32 %v1473_v8, %v1415_v34  ;;  %v728_v55 = vcombine.high %v1467_v4, %v1467_v4  ;;  %v255_v23 = vmul.f32 %v181_v49, %v1373_v9 }
  0x28   :  { %v270_v58 = vmul.f32 0.33333334, %v254_v50  ;;  %v446_v60 = vrot.slane %v364_v57, %v1391_v21  ;;  %v519_v62 = vmul.f32 %v442_v1, %v1375_v10  ;;  %v632_v29 = vmul.f32 %v177_v43, %v1375_v10 }
  0x29   :  { %v1273_v59 = vcombine.low %v985_v47, %v986_v53  ;;  %v600_v6 = vcombine.high %v584_v32, %v584_v32  ;;  %v735_v37 = vrot.slane %v1467_v4, %v1381_v15  ;;  %v271_v13 = vmul.f32 0.33333334, %v255_v23 }
  0x2a   :  { %v520_v16 = vmul.f32 %v446_v60, %v1375_v10  ;;  %v535_v22 = vmul.f32 0.33333334, %v519_v62  ;;  %v742_v28 = vrot.slane %v728_v55, %v1381_v15  ;;  %v1007_v41 = vmul.f32 %v1480_v18, %v1412_v33 }
  0x2b   :  { %1277 = vst [vmem:[%s1877_s2 + $0x8] sm:$0xff] %v1273_v59  ;;  %v820_v40 = vrot.slane %v735_v37, %v1391_v21  ;;  %v1066_v43 = vcombine.high %v1486_v24, %v1486_v24  ;;  %v1073_v4 = vrot.slane %v1486_v24, %v1381_v15  ;;  %v100_v1 = vcombine.high %v92_v26, %v92_v26 }
  0x2c   :  { %v536_v46 = vmul.f32 0.33333334, %v520_v16  ;;  %v564_v47 = vadd.f32 %v535_v22, %v270_v58  ;;  %v824_v50 = vrot.slane %v742_v28, %v1391_v21  ;;  %v633_v53 = vmul.f32 %v181_v49, %v1375_v10 }
  0x2d   :  { %v897_v55 = vmul.f32 %v820_v40, %v1377_v12  ;;  %v1080_v23 = vrot.slane %v1066_v43, %v1381_v15  ;;  %v1158_v60 = vrot.slane %v1073_v4, %v1391_v21  ;;  %v101_v0 = vcombine.high %v99_v42, %v99_v42 }
  0x2e   :  { %v565_v62 = vadd.f32 %v536_v46, %v271_v13  ;;  %v616_v59 = vadd.f32 %v584_v32, %v564_v47  ;;  %v898_v20 = vmul.f32 %v824_v50, %v1377_v12  ;;  %v1023_v24 = vcombine.high %v1007_v41, %v1007_v41 }
  0x2f   :  { %v913_v17 = vmul.f32 0.33333334, %v897_v55  ;;  %v1162_v58 = vrot.slane %v1080_v23, %v1391_v21  ;;  %v185_v16 = vrot.slane %v100_v1, %v1391_v21  ;;  %v189_v40 = vrot.slane %v101_v0, %v1391_v21 }
  0x30   :  { %v617_v26 = vadd.f32 %v600_v6, %v565_v62  ;;  %v648_v22 = vadd.f32 %v632_v29, %v616_v59  ;;  %v914_v49 = vmul.f32 0.33333334, %v898_v20  ;;  %v1235_v43 = vmul.f32 %v1158_v60, %v1377_v12 }
  0x31   :  { %v256_v63 = vmul.f32 %v185_v16, %v1373_v9  ;;  %v365_v13 = vcombine.high %v357_v45, %v357_v45  ;;  %v366_v32 = vcombine.high %v364_v57, %v364_v57  ;;  %v257_v42 = vmul.f32 %v189_v40, %v1373_v9 }
  0x32   :  { %v649_v46 = vadd.f32 %v633_v53, %v617_v26  ;;  %v987_v47 = vadd.f32 %v913_v17, %v648_v22  ;;  %v585_v50 = vmul.f32 %v1546_v7, %v1415_v34  ;;  %v1236_v1 = vmul.f32 %v1162_v58, %v1377_v12 }
  0x33   :  { %v272_v6 = vmul.f32 0.33333334, %v256_v63  ;;  %v450_v20 = vrot.slane %v365_v13, %v1391_v21  ;;  %v454_v0 = vrot.slane %v366_v32, %v1391_v21  ;;  %v273_v60 = vmul.f32 0.33333334, %v257_v42 }
  0x34   :  { %v988_v29 = vadd.f32 %v914_v49, %v649_v46  ;;  %v1039_v55 = vadd.f32 %v1007_v41, %v987_v47  ;;  %v634_v45 = vmul.f32 %v185_v16, %v1375_v10  ;;  %v601_v53 = vcombine.high %v585_v50, %v585_v50 }
  0x35   :  { %v521_v57 = vmul.f32 %v450_v20, %v1375_v10  ;;  %v522_v17 = vmul.f32 %v454_v0, %v1375_v10  ;;  %v743_v62 = vcombine.high %v735_v37, %v735_v37  ;;  %v744_v26 = vcombine.high %v742_v28, %v742_v28 }
  0x36   :  { %v1040_v59 = vadd.f32 %v1023_v24, %v988_v29  ;;  %v1251_v34 = vadd.f32 %v1235_v43, %v1039_v55  ;;  %v1008_v63 = vmul.f32 %v1583_v54, %v1412_v33  ;;  %v1081_v41 = vcombine.high %v1073_v4, %v1073_v4 }
  0x37   :  { %v537_v58 = vmul.f32 0.33333334, %v521_v57  ;;  %v538_v22 = vmul.f32 0.33333334, %v522_v17  ;;  %v828_v49 = vrot.slane %v743_v62, %v1391_v21  ;;  %v635_v16 = vmul.f32 %v189_v40, %v1375_v10 }
  0x38   :  { %v1252_v13 = vadd.f32 %v1236_v1, %v1040_v59  ;;  %v832_v32 = vrot.slane %v744_v26, %v1391_v21  ;;  %v1082_v46 = vcombine.high %v1080_v23, %v1080_v23  ;;  %v1166_v28 = vrot.slane %v1081_v41, %v1391_v21 }
  0x39   :  { %v566_v47 = vadd.f32 %v537_v58, %v272_v6  ;;  %v567_v42 = vadd.f32 %v538_v22, %v273_v60  ;;  %v899_v37 = vmul.f32 %v828_v49, %v1377_v12  ;;  %v116_v4 = vrot.slane %v1457_v61, %v1381_v15 }
  0x3a   :  { %v1294_v24 = vcombine.low %v1251_v34, %v1252_v13  ;;  %v900_v33 = vmul.f32 %v832_v32, %v1377_v12  ;;  %v1170_v43 = vrot.slane %v1082_v46, %v1391_v21  ;;  %v1024_v0 = vcombine.high %v1008_v63, %v1008_v63 }
  0x3b   :  { %v618_v1 = vadd.f32 %v585_v50, %v566_v47  ;;  %v619_v20 = vadd.f32 %v601_v53, %v567_v42  ;;  %v915_v40 = vmul.f32 0.33333334, %v899_v37  ;;  %v1237_v6 = vmul.f32 %v1166_v28, %v1377_v12 }
  0x3c   :  { %1310 = vst [vmem:[%s1878_s3] sm:$0xff] %v1294_v24  ;;  %v916_v23 = vmul.f32 0.33333334, %v900_v33  ;;  %v123_v29 = vrot.slane %v109_v5, %v1381_v15  ;;  %v193_v55 = vrot.slane %v116_v4, %v1391_v21  ;;  %v1649_v50 = vrot.slane %v1464_v2, %v1381_v15 }
  0x3d   :  { %v650_v60 = vadd.f32 %v634_v45, %v618_v1  ;;  %v651_v57 = vadd.f32 %v635_v16, %v619_v20  ;;  %v1655_v17 = vrot.slane %v374_v11, %v1381_v15  ;;  %v1238_v53 = vmul.f32 %v1170_v43, %v1377_v12 }
  0x3e   :  { %v197_v62 = vrot.slane %v123_v29, %v1391_v21  ;;  %v258_v61 = vmul.f32 %v193_v55, %v1373_v9  ;;  %v586_v5 = vmul.f32 %v1473_v8, %v1422_v38  ;;  %v458_v34 = vrot.slane %v1649_v50, %v1391_v21 }
  0x3f   :  { %v989_v45 = vadd.f32 %v915_v40, %v650_v60  ;;  %v990_v59 = vadd.f32 %v916_v23, %v651_v57  ;;  %v462_v26 = vrot.slane %v1655_v17, %v1391_v21  ;;  %v636_v22 = vmul.f32 %v193_v55, %v1375_v10 }
  0x40   :  { %v259_v2 = vmul.f32 %v197_v62, %v1373_v9  ;;  %v274_v11 = vmul.f32 0.33333334, %v258_v61  ;;  %v602_v58 = vcombine.high %v586_v5, %v586_v5  ;;  %v523_v13 = vmul.f32 %v458_v34, %v1375_v10 }
  0x41   :  { %v1041_v49 = vadd.f32 %v1008_v63, %v989_v45  ;;  %v1042_v41 = vadd.f32 %v1024_v0, %v990_v59  ;;  %v524_v16 = vmul.f32 %v462_v26, %v1375_v10  ;;  %v637_v46 = vmul.f32 %v197_v62, %v1375_v10 }
  0x42   :  { %v275_v32 = vmul.f32 0.33333334, %v259_v2  ;;  %v752_v47 = vcombine.high %v1478_v14, %v1478_v14  ;;  %v759_v42 = vrot.slane %v1478_v14, %v1381_v15  ;;  %v539_v24 = vmul.f32 0.33333334, %v523_v13 }
  0x43   :  { %v1253_v37 = vadd.f32 %v1237_v6, %v1041_v49  ;;  %v1254_v28 = vadd.f32 %v1238_v53, %v1042_v41  ;;  %v540_v33 = vmul.f32 0.33333334, %v524_v16  ;;  %v1009_v1 = vmul.f32 %v1480_v18, %v1435_v44 }
  0x44   :  { %v766_v63 = vrot.slane %v752_v47, %v1381_v15  ;;  %v836_v43 = vrot.slane %v759_v42, %v1391_v21  ;;  %v1090_v20 = vcombine.high %v1492_v36, %v1492_v36  ;;  %v568_v0 = vadd.f32 %v539_v24, %v274_v11 }
  0x45   :  { %v1295_v40 = vcombine.low %v1253_v37, %v1254_v28  ;;  %v569_v23 = vadd.f32 %v540_v33, %v275_v32  ;;  %v1097_v14 = vrot.slane %v1492_v36, %v1381_v15  ;;  %v124_v57 = vcombine.high %v116_v4, %v116_v4 }
  0x46   :  { %v840_v6 = vrot.slane %v766_v63, %v1391_v21  ;;  %v901_v55 = vmul.f32 %v836_v43, %v1377_v12  ;;  %v1104_v60 = vrot.slane %v1090_v20, %v1381_v15  ;;  %v620_v53 = vadd.f32 %v586_v5, %v568_v0 }
  0x47   :  { %1311 = vst [vmem:[%s1878_s3 + $0x8] sm:$0xff] %v1295_v40  ;;  %v621_v62 = vadd.f32 %v602_v58, %v569_v23  ;;  %v1174_v61 = vrot.slane %v1097_v14, %v1391_v21  ;;  %v125_v45 = vcombine.high %v123_v29, %v123_v29  ;;  %v201_v26 = vrot.slane %v124_v57, %v1391_v21 }
  0x48   :  { %v902_v59 = vmul.f32 %v840_v6, %v1377_v12  ;;  %v917_v34 = vmul.f32 0.33333334, %v901_v55  ;;  %v1178_v36 = vrot.slane %v1104_v60, %v1391_v21  ;;  %v652_v2 = vadd.f32 %v636_v22, %v620_v53 }
  0x49   :  { %v653_v11 = vadd.f32 %v637_v46, %v621_v62  ;;  %v1025_v49 = vcombine.high %v1009_v1, %v1009_v1  ;;  %v205_v4 = vrot.slane %v125_v45, %v1391_v21  ;;  %v1239_v13 = vmul.f32 %v1174_v61, %v1377_v12 }
  0x4a   :  { %v918_v41 = vmul.f32 0.33333334, %v902_v59  ;;  %v260_v5 = vmul.f32 %v201_v26, %v1373_v9  ;;  %v389_v29 = vcombine.high %v1649_v50, %v1649_v50  ;;  %v991_v58 = vadd.f32 %v917_v34, %v652_v2 }
  0x4b   :  { %v261_v16 = vmul.f32 %v205_v4, %v1373_v9  ;;  %v390_v32 = vcombine.high %v1655_v17, %v1655_v17  ;;  %v587_v22 = vmul.f32 %v1546_v7, %v1422_v38  ;;  %v1240_v47 = vmul.f32 %v1178_v36, %v1377_v12 }
  0x4c   :  { %v992_v46 = vadd.f32 %v918_v41, %v653_v11  ;;  %v276_v37 = vmul.f32 0.33333334, %v260_v5  ;;  %v466_v28 = vrot.slane %v389_v29, %v1391_v21  ;;  %v1043_v24 = vadd.f32 %v1009_v1, %v991_v58 }
  0x4d   :  { %v277_v33 = vmul.f32 0.33333334, %v261_v16  ;;  %v470_v43 = vrot.slane %v390_v32, %v1391_v21  ;;  %v638_v50 = vmul.f32 %v201_v26, %v1375_v10  ;;  %v603_v0 = vcombine.high %v587_v22, %v587_v22 }
  0x4e   :  { %v1044_v20 = vadd.f32 %v1025_v49, %v992_v46  ;;  %v525_v40 = vmul.f32 %v466_v28, %v1375_v10  ;;  %v767_v17 = vcombine.high %v759_v42, %v759_v42  ;;  %v1255_v23 = vadd.f32 %v1239_v13, %v1043_v24 }
  0x4f   :  { %v526_v38 = vmul.f32 %v470_v43, %v1375_v10  ;;  %v768_v6 = vcombine.high %v766_v63, %v766_v63  ;;  %v1010_v55 = vmul.f32 %v1583_v54, %v1435_v44  ;;  %v1105_v62 = vcombine.high %v1097_v14, %v1097_v14 }
  0x50   :  { %v1256_v57 = vadd.f32 %v1240_v47, %v1044_v20  ;;  %v541_v53 = vmul.f32 0.33333334, %v525_v40  ;;  %v844_v1 = vrot.slane %v767_v17, %v1391_v21  ;;  %v639_v45 = vmul.f32 %v205_v4, %v1375_v10 }
  0x51   :  { %v542_v61 = vmul.f32 0.33333334, %v526_v38  ;;  %v848_v59 = vrot.slane %v768_v6, %v1391_v21  ;;  %v1106_v34 = vcombine.high %v1104_v60, %v1104_v60  ;;  %v1182_v63 = vrot.slane %v1105_v62, %v1391_v21 }
  0x52   :  { %v1296_v36 = vcombine.low %v1255_v23, %v1256_v57  ;;  %v570_v42 = vadd.f32 %v541_v53, %v276_v37  ;;  %v903_v26 = vmul.f32 %v844_v1, %v1377_v12  ;;  %v140_v14 = vrot.slane %v1515_v52, %v1381_v15 }
  0x53   :  { %v571_v2 = vadd.f32 %v542_v61, %v277_v33  ;;  %v904_v44 = vmul.f32 %v848_v59, %v1377_v12  ;;  %v1186_v11 = vrot.slane %v1106_v34, %v1391_v21  ;;  %v1026_v4 = vcombine.high %v1010_v55, %v1010_v55 }
  0x54   :  { %1312 = vst [vmem:[%s1878_s3 + $0x10] sm:$0xff] %v1296_v36  ;;  %v622_v49 = vadd.f32 %v587_v22, %v570_v42  ;;  %v919_v60 = vmul.f32 0.33333334, %v903_v26  ;;  %v1879_v41 = vcombine.high %v1515_v52, %v1515_v52  ;;  %v1241_v58 = vmul.f32 %v1182_v63, %v1377_v12 }
  0x55   :  { %v623_v5 = vadd.f32 %v603_v0, %v571_v2  ;;  %v920_v29 = vmul.f32 0.33333334, %v904_v44  ;;  %v209_v16 = vrot.slane %v140_v14, %v1391_v21  ;;  %v405_v47 = vrot.slane %v1534_v56, %v1381_v15 }
  0x56   :  { %v147_v13 = vrot.slane %v1879_v41, %v1381_v15  ;;  %v654_v32 = vadd.f32 %v638_v50, %v622_v49  ;;  %v1880_v22 = vcombine.high %v1534_v56, %v1534_v56  ;;  %v1242_v28 = vmul.f32 %v1186_v11, %v1377_v12 }
  0x57   :  { %v655_v52 = vadd.f32 %v639_v45, %v623_v5  ;;  %v262_v24 = vmul.f32 %v209_v16, %v1373_v9  ;;  %v588_v33 = vmul.f32 %v1473_v8, %v1483_v19  ;;  %v474_v20 = vrot.slane %v405_v47, %v1391_v21 }
  0x58   :  { %v213_v46 = vrot.slane %v147_v13, %v1391_v21  ;;  %v1736_v37 = vrot.slane %v1880_v22, %v1381_v15  ;;  %v993_v43 = vadd.f32 %v919_v60, %v654_v32  ;;  %v640_v23 = vmul.f32 %v209_v16, %v1375_v10 }
  0x59   :  { %v994_v0 = vadd.f32 %v920_v29, %v655_v52  ;;  %v278_v56 = vmul.f32 0.33333334, %v262_v24  ;;  %v604_v17 = vcombine.high %v588_v33, %v588_v33  ;;  %v527_v57 = vmul.f32 %v474_v20, %v1375_v10 }
  0x5a   :  { %v263_v50 = vmul.f32 %v213_v46, %v1373_v9  ;;  %v478_v40 = vrot.slane %v1736_v37, %v1391_v21  ;;  %v1045_v38 = vadd.f32 %v1010_v55, %v993_v43  ;;  %v641_v62 = vmul.f32 %v213_v46, %v1375_v10 }
  0x5b   :  { %v1046_v1 = vadd.f32 %v1026_v4, %v994_v0  ;;  %v776_v61 = vcombine.high %v1556_v31, %v1556_v31  ;;  %v783_v45 = vrot.slane %v1556_v31, %v1381_v15  ;;  %v543_v34 = vmul.f32 0.33333334, %v527_v57 }
  0x5c   :  { %v279_v6 = vmul.f32 0.33333334, %v263_v50  ;;  %v528_v53 = vmul.f32 %v478_v40, %v1375_v10  ;;  %v1257_v59 = vadd.f32 %v1241_v58, %v1045_v38  ;;  %v1114_v55 = vcombine.high %v1561_v27, %v1561_v27 }
  0x5d   :  { %v1258_v42 = vadd.f32 %v1242_v28, %v1046_v1  ;;  %v790_v26 = vrot.slane %v776_v61, %v1381_v15  ;;  %v852_v63 = vrot.slane %v783_v45, %v1391_v21  ;;  %v1011_v2 = vmul.f32 %v1480_v18, %v1512_v51 }
  0x5e   :  { %v544_v36 = vmul.f32 0.33333334, %v528_v53  ;;  %v572_v44 = vadd.f32 %v543_v34, %v278_v56  ;;  %v1121_v49 = vrot.slane %v1561_v27, %v1381_v15  ;;  %v1128_v31 = vrot.slane %v1114_v55, %v1381_v15 }
  0x5f   :  { %v1297_v60 = vcombine.low %v1257_v59, %v1258_v42  ;;  %v856_v4 = vrot.slane %v790_v26, %v1391_v21  ;;  %v905_v41 = vmul.f32 %v852_v63, %v1377_v12  ;;  %v148_v5 = vcombine.high %v140_v14, %v140_v14 }
  0x60   :  { %v573_v11 = vadd.f32 %v544_v36, %v279_v6  ;;  %v624_v29 = vadd.f32 %v588_v33, %v572_v44  ;;  %v1190_v16 = vrot.slane %v1121_v49, %v1391_v21  ;;  %v1194_v32 = vrot.slane %v1128_v31, %v1391_v21 }
  0x61   :  { %1313 = vst [vmem:[%s1878_s3 + $0x18] sm:$0xff] %v1297_v60  ;;  %v906_v27 = vmul.f32 %v856_v4, %v1377_v12  ;;  %v921_v46 = vmul.f32 0.33333334, %v905_v41  ;;  %v149_v22 = vcombine.high %v147_v13, %v147_v13  ;;  %v217_v52 = vrot.slane %v148_v5, %v1391_v21 }
  0x62   :  { %v625_v58 = vadd.f32 %v604_v17, %v573_v11  ;;  %v656_v28 = vadd.f32 %v640_v23, %v624_v29  ;;  %v1027_v43 = vcombine.high %v1011_v2, %v1011_v2  ;;  %v1243_v14 = vmul.f32 %v1190_v16, %v1377_v12 }
  0x63   :  { %v922_v33 = vmul.f32 0.33333334, %v906_v27  ;;  %v221_v50 = vrot.slane %v149_v22, %v1391_v21  ;;  %v264_v20 = vmul.f32 %v217_v52, %v1373_v9  ;;  %v413_v40 = vcombine.high %v405_v47, %v405_v47 }
  0x64   :  { %v657_v24 = vadd.f32 %v641_v62, %v625_v58  ;;  %v995_v0 = vadd.f32 %v921_v46, %v656_v28  ;;  %v1244_v56 = vmul.f32 %v1194_v32, %v1377_v12  ;;  %v414_v17 = vcombine.high %v1736_v37, %v1736_v37 }
  0x65   :  { %v589_v13 = vmul.f32 %v1546_v7, %v1483_v19  ;;  %v265_v38 = vmul.f32 %v221_v50, %v1373_v9  ;;  %v482_v6 = vrot.slane %v413_v40, %v1391_v21  ;;  %v642_v57 = vmul.f32 %v217_v52, %v1375_v10 }
  0x66   :  { %v996_v23 = vadd.f32 %v922_v33, %v657_v24  ;;  %v1047_v53 = vadd.f32 %v1011_v2, %v995_v0  ;;  %v280_v1 = vmul.f32 0.33333334, %v264_v20  ;;  %v486_v47 = vrot.slane %v414_v17, %v1391_v21 }
  0x67   :  { %v605_v62 = vcombine.high %v589_v13, %v589_v13  ;;  %v281_v59 = vmul.f32 0.33333334, %v265_v38  ;;  %v529_v34 = vmul.f32 %v482_v6, %v1375_v10  ;;  %v791_v37 = vcombine.high %v783_v45, %v783_v45 }
  0x68   :  { %v1048_v61 = vadd.f32 %v1027_v43, %v996_v23  ;;  %v1259_v36 = vadd.f32 %v1243_v14, %v1047_v53  ;;  %v530_v19 = vmul.f32 %v486_v47, %v1375_v10  ;;  %v792_v55 = vcombine.high %v790_v26, %v790_v26 }
  0x69   :  { %v1012_v42 = vmul.f32 %v1583_v54, %v1512_v51  ;;  %v545_v44 = vmul.f32 0.33333334, %v529_v34  ;;  %v860_v2 = vrot.slane %v791_v37, %v1391_v21  ;;  %v1129_v11 = vcombine.high %v1121_v49, %v1121_v49 }
  0x6a   :  { %v1260_v63 = vadd.f32 %v1244_v56, %v1048_v61  ;;  %v546_v60 = vmul.f32 0.33333334, %v530_v19  ;;  %v643_v4 = vmul.f32 %v221_v50, %v1375_v10  ;;  %v864_v41 = vrot.slane %v792_v55, %v1391_v21 }
  0x6b   :  { %v1130_v5 = vcombine.high %v1128_v31, %v1128_v31  ;;  %v574_v45 = vadd.f32 %v545_v44, %v280_v1  ;;  %v907_v58 = vmul.f32 %v860_v2, %v1377_v12  ;;  %v1198_v26 = vrot.slane %v1129_v11, %v1391_v21 }
  0x6c   :  { %v1298_v29 = vcombine.low %v1259_v36, %v1260_v63  ;;  %v575_v16 = vadd.f32 %v546_v60, %v281_v59  ;;  %v908_v51 = vmul.f32 %v864_v41, %v1377_v12  ;;  %v164_v49 = vrot.slane %v1523_v39, %v1381_v15 }
  0x6d   :  { %v1202_v32 = vrot.slane %v1130_v5, %v1391_v21  ;;  %v626_v27 = vadd.f32 %v589_v13, %v574_v45  ;;  %v923_v31 = vmul.f32 0.33333334, %v907_v58  ;;  %v1028_v46 = vcombine.high %v1012_v42, %v1012_v42 }
  0x6e   :  { %1314 = vst [vmem:[%s1878_s3 + $0x20] sm:$0xff] %v1298_v29  ;;  %v1881_v22 = vcombine.high %v1523_v39, %v1523_v39  ;;  %v627_v28 = vadd.f32 %v605_v62, %v575_v16  ;;  %v924_v24 = vmul.f32 0.33333334, %v908_v51  ;;  %v1245_v43 = vmul.f32 %v1198_v26, %v1377_v12 }
  0x6f   :  { %v225_v14 = vrot.slane %v164_v49, %v1391_v21  ;;  %v658_v33 = vadd.f32 %v642_v57, %v626_v27  ;;  %v429_v20 = vrot.slane %v1544_v3, %v1381_v15  ;;  %v1882_v40 = vcombine.high %v1544_v3, %v1544_v3 }
  0x70   :  { %v171_v52 = vrot.slane %v1881_v22, %v1381_v15  ;;  %v659_v56 = vadd.f32 %v643_v4, %v627_v28  ;;  %v1246_v39 = vmul.f32 %v1202_v32, %v1377_v12  ;;  %v590_v13 = vmul.f32 %v1473_v8, %v1489_v25 }
  0x71   :  { %v436_v0 = vrot.slane %v1882_v40, %v1381_v15  ;;  %v266_v17 = vmul.f32 %v225_v14, %v1373_v9  ;;  %v997_v23 = vadd.f32 %v923_v31, %v658_v33  ;;  %v490_v6 = vrot.slane %v429_v20, %v1391_v21 }
  0x72   :  { %v229_v50 = vrot.slane %v171_v52, %v1391_v21  ;;  %v998_v53 = vadd.f32 %v924_v24, %v659_v56  ;;  %v606_v47 = vcombine.high %v590_v13, %v590_v13  ;;  %v644_v3 = vmul.f32 %v225_v14, %v1375_v10 }
  0x73   :  { %v494_v57 = vrot.slane %v436_v0, %v1391_v21  ;;  %v282_v1 = vmul.f32 0.33333334, %v266_v17  ;;  %v1049_v62 = vadd.f32 %v1012_v42, %v997_v23  ;;  %v531_v59 = vmul.f32 %v490_v6, %v1375_v10 }
  0x74   :  { %v267_v38 = vmul.f32 %v229_v50, %v1373_v9  ;;  %v1050_v37 = vadd.f32 %v1028_v46, %v998_v53  ;;  %v645_v8 = vmul.f32 %v229_v50, %v1375_v10  ;;  %v800_v36 = vcombine.high %v1571_v35, %v1571_v35 }
  0x75   :  { %v532_v34 = vmul.f32 %v494_v57, %v1375_v10  ;;  %v807_v19 = vrot.slane %v1571_v35, %v1381_v15  ;;  %v1261_v55 = vadd.f32 %v1245_v43, %v1049_v62  ;;  %v547_v63 = vmul.f32 0.33333334, %v531_v59 }
  0x76   :  { %v283_v61 = vmul.f32 0.33333334, %v267_v38  ;;  %v1138_v42 = vcombine.high %v1574_v48, %v1574_v48  ;;  %v1262_v2 = vadd.f32 %v1246_v39, %v1050_v37  ;;  %v814_v11 = vrot.slane %v800_v36, %v1381_v15 }
  0x77   :  { %v548_v44 = vmul.f32 0.33333334, %v532_v34  ;;  %v868_v60 = vrot.slane %v807_v19, %v1391_v21  ;;  %v1013_v4 = vmul.f32 %v1480_v18, %v1531_v30  ;;  %v576_v41 = vadd.f32 %v547_v63, %v282_v1 }
  0x78   :  { %v1145_v29 = vrot.slane %v1574_v48, %v1381_v15  ;;  %v1152_v35 = vrot.slane %v1138_v42, %v1381_v15  ;;  %v1299_v45 = vcombine.low %v1261_v55, %v1262_v2  ;;  %v872_v58 = vrot.slane %v814_v11, %v1391_v21 }
  0x79   :  { %v577_v5 = vadd.f32 %v548_v44, %v283_v61  ;;  %v909_v26 = vmul.f32 %v868_v60, %v1377_v12  ;;  %v172_v16 = vcombine.high %v164_v49, %v164_v49  ;;  %v628_v51 = vadd.f32 %v590_v13, %v576_v41 }
  0x7a   :  { %v1206_v27 = vrot.slane %v1145_v29, %v1391_v21  ;;  %v1210_v31 = vrot.slane %v1152_v35, %v1391_v21  ;;  %1315 = vst [vmem:[%s1878_s3 + $0x28] sm:$0xff] %v1299_v45  ;;  %v910_v18 = vmul.f32 %v872_v58, %v1377_v12  ;;  %v173_v15 = vcombine.high %v171_v52, %v171_v52 }
  0x7b   :  { %v629_v32 = vadd.f32 %v606_v47, %v577_v5  ;;  %v925_v48 = vmul.f32 0.33333334, %v909_v26  ;;  %v233_v46 = vrot.slane %v172_v16, %v1391_v21  ;;  %v660_v22 = vadd.f32 %v644_v3, %v628_v51 }
  0x7c   :  { %v1029_v24 = vcombine.high %v1013_v4, %v1013_v4  ;;  %v926_v49 = vmul.f32 0.33333334, %v910_v18  ;;  %v237_v43 = vrot.slane %v173_v15, %v1391_v21  ;;  %v437_v33 = vcombine.high %v429_v20, %v429_v20 }
  0x7d   :  { %v661_v28 = vadd.f32 %v645_v8, %v629_v32  ;;  %v268_v14 = vmul.f32 %v233_v46, %v1373_v9  ;;  %v999_v50 = vadd.f32 %v925_v48, %v660_v22  ;;  %v1247_v40 = vmul.f32 %v1206_v27, %v1377_v12 }
  0x7e   :  { %v438_v56 = vcombine.high %v436_v0, %v436_v0  ;;  %v1248_v17 = vmul.f32 %v1210_v31, %v1377_v12  ;;  %v269_v52 = vmul.f32 %v237_v43, %v1373_v9  ;;  %v498_v13 = vrot.slane %v437_v33, %v1391_v21 }
  0x7f   :  { %v1000_v39 = vadd.f32 %v926_v49, %v661_v28  ;;  %v1051_v23 = vadd.f32 %v1013_v4, %v999_v50  ;;  %v591_v6 = vmul.f32 %v1546_v7, %v1489_v25  ;;  %v284_v53 = vmul.f32 0.33333334, %v268_v14 }
  0x80   :  { %v502_v38 = vrot.slane %v438_v56, %v1391_v21  ;;  %v533_v20 = vmul.f32 %v498_v13, %v1375_v10  ;;  %v815_v1 = vcombine.high %v807_v19, %v807_v19  ;;  %v285_v0 = vmul.f32 0.33333334, %v269_v52 }
  0x81   :  { %v1052_v57 = vadd.f32 %v1029_v24, %v1000_v39  ;;  %v1263_v47 = vadd.f32 %v1247_v40, %v1051_v23  ;;  %v816_v62 = vcombine.high %v814_v11, %v814_v11  ;;  %v1153_v34 = vcombine.high %v1145_v29, %v1145_v29 }
  0x82   :  { %v534_v3 = vmul.f32 %v502_v38, %v1375_v10  ;;  %v549_v9 = vmul.f32 0.33333334, %v533_v20  ;;  %v876_v59 = vrot.slane %v815_v1, %v1391_v21  ;;  %v607_v8 = vcombine.high %v591_v6, %v591_v6 }
  0x83   :  { %v1264_v61 = vadd.f32 %v1248_v17, %v1052_v57  ;;  %v880_v36 = vrot.slane %v816_v62, %v1391_v21  ;;  %v1154_v25 = vcombine.high %v1152_v35, %v1152_v35  ;;  %v646_v63 = vmul.f32 %v233_v46, %v1375_v10 }
  0x84   :  { %v550_v37 = vmul.f32 0.33333334, %v534_v3  ;;  %v578_v55 = vadd.f32 %v549_v9, %v284_v53  ;;  %v911_v19 = vmul.f32 %v876_v59, %v1377_v12  ;;  %v647_v42 = vmul.f32 %v237_v43, %v1375_v10 }
  0x85   :  { %v1300_v7 = vcombine.low %v1263_v47, %v1264_v61  ;;  %v912_v2 = vmul.f32 %v880_v36, %v1377_v12  ;;  %v1014_v11 = vmul.f32 %v1583_v54, %v1531_v30  ;;  %v1214_v41 = vrot.slane %v1153_v34, %v1391_v21 }
  0x86   :  { %v579_v44 = vadd.f32 %v550_v37, %v285_v0  ;;  %v630_v60 = vadd.f32 %v591_v6, %v578_v55  ;;  %v927_v4 = vmul.f32 0.33333334, %v911_v19  ;;  %v1218_v35 = vrot.slane %v1154_v25, %v1391_v21 }
  0x87   :  { %1316 = vst [vmem:[%s1878_s3 + $0x30] sm:$0xff] %v1300_v7  ;;  %v928_v29 = vmul.f32 0.33333334, %v912_v2  ;;  %v1030_v10 = vcombine.high %v1014_v11, %v1014_v11  ;;  %v1249_v16 = vmul.f32 %v1214_v41, %v1377_v12 }
  0x88   :  { %v631_v5 = vadd.f32 %v607_v8, %v579_v44  ;;  %v662_v45 = vadd.f32 %v646_v63, %v630_v60  ;;  %v1250_v30 = vmul.f32 %v1218_v35, %v1377_v12 }
  0x8a   :  { %v663_v58 = vadd.f32 %v647_v42, %v631_v5  ;;  %v1001_v26 = vadd.f32 %v927_v4, %v662_v45 }
  0x8c   :  { %v1002_v51 = vadd.f32 %v928_v29, %v663_v58  ;;  %v1053_v54 = vadd.f32 %v1014_v11, %v1001_v26 }
  0x8e   :  { %v1054_v32 = vadd.f32 %v1030_v10, %v1002_v51  ;;  %v1265_v27 = vadd.f32 %v1249_v16, %v1053_v54 }
  0x90   :  { %v1266_v31 = vadd.f32 %v1250_v30, %v1054_v32 }
  0x92   :  { %v1301_v18 = vcombine.low %v1265_v27, %v1266_v31 }
  0x94   :  { %1317 = vst [vmem:[%s1878_s3 + $0x38] sm:$0xff] %v1301_v18 }

</bundles_post_ra>
